<compile_context>
chip_gen: v7x
topology: tpu7x:2x2x1
jax: 0.10.0
libtpu: 0.0.40
codegen_flags: <defaults>
</compile_context>

<pallas_src>
import functools

import jax
import jax.numpy as jnp
from jax import lax
from jax.experimental import pallas as pl
from jax.experimental.pallas import tpu as pltpu


def _vmem_budget_bytes():
    """~75% of this generation's physical VMEM (v5e/v6e: 128 MiB, v7x: 64 MiB)."""
    try:
        cap = int(pltpu.get_tpu_info().vmem_capacity_bytes)
    except Exception:  # no TPU info available: fall back to a v7x-safe budget
        cap = 64 * 1024 * 1024
    budget = (cap * 3) // 4
    return max(32 * 1024 * 1024, min(budget, 100 * 1024 * 1024))


def _pick_tiles(T, B, H, vmem_budget, mm_bytes):
    """Pick (batch_tile, t_chunk).

    Prefers the largest batch tile first (toward MXU height, <=256), then the
    T chunk, subject to a VMEM cost model that explicitly counts BlockSpec
    double-buffering on every streamed block.
    """
    def need(tb, tc):
        gx = 2 * 2 * tc * tb * 3 * H * mm_bytes   # gx_f + gx_b blocks, x2 pipeline bufs
        out = 2 * 2 * tc * tb * H * 4             # out_f + out_b blocks, x2 pipeline bufs
        hid = 2 * 2 * 2 * tb * H * 4              # h0 + hn blocks, x2 pipeline bufs
        w = 2 * 2 * H * 3 * H * mm_bytes          # whh_f + whh_b, x2 pipeline bufs
        return gx + out + hid + w + (2 << 20)     # ~2 MiB Mosaic-internal slack

    if B % 8 == 0:
        tb_cands = sorted((tb for tb in range(8, B + 1, 8) if B % tb == 0),
                          key=lambda tb: (tb > 256, -tb if tb <= 256 else tb))
    else:
        tb_cands = [B]

    tc_base = {t for t in (256, 128, 64, 32, 16, 8, min(T, 256)) if t <= T} or {T}
    # minimize padded length first, then prefer the larger chunk
    tc_cands = sorted(tc_base, key=lambda tc: (-(-T // tc) * tc, -tc))

    for tb in tb_cands:
        for tc in tc_cands:
            if need(tb, tc) <= vmem_budget:
                return tb, tc
    return min(tb_cands), min(tc_cands)


def _pick_unroll(t_chunk, TB, H):
    """Unroll factor capped by vreg pressure: ~12 live (TB,H) f32 temps per
    interleaved fwd+bwd iteration; keep within ~half the 64 x 4 KiB vreg file."""
    per_iter = 12 * TB * H * 4
    u = max(1, min(8, t_chunk, (128 * 1024) // per_iter))
    while u > 1 and t_chunk % u:
        u -= 1
    return u


def _bidir_gru_kernel(gx_f_ref, gx_b_ref, len_ref, h0_ref,
                      whh_f_ref, whh_b_ref, bhn_f_ref, bhn_b_ref,
                      out_f_ref, out_b_ref, hn_ref, *, unroll):
    """Interleaved fwd/bwd GRU recurrence for one (batch-tile, T-chunk) block."""
    TC = gx_f_ref.shape[0]
    H = hn_ref.shape[2]

    c = pl.program_id(1)
    t0_f = c * TC                                # global t of fwd local step 0
    t0_b = (pl.num_programs(1) - 1 - c) * TC     # global t of bwd local step 0

    # Hidden state is carried across T-chunks directly in the resident hn
    # output block (constant block index along the "arbitrary" chunk axis).
    @pl.when(c == 0)
    def _():
        hn_ref[...] = h0_ref[...]

    lengths = len_ref[...]                       # (TB, 1) int32
    bhn_f = bhn_f_ref[...].astype(jnp.float32)   # (1, H), broadcast in the add
    bhn_b = bhn_b_ref[...].astype(jnp.float32)

    def _sigmoid(x):
        # tanh form of sigmoid: a single EUP push per call (v5e has 1 EUP).
        return 0.5 * jnp.tanh(0.5 * x) + 0.5

    def gru_step(gx_t, h, whh_ref, bhn):
        # Single fused (TB,H) @ (H,3H) MXU call: one push/drain sequence on the
        # serial chain instead of three per-gate matmuls.  h carried f32, cast
        # to the matmul dtype only as LHS.
        gh = jnp.dot(h.astype(whh_ref.dtype), whh_ref[...],
                     preferred_element_type=jnp.float32)
        gx32 = gx_t.astype(jnp.float32)
        rz = _sigmoid(gx32[:, :2 * H] + gh[:, :2 * H])     # r and z in one EUP-wide op
        r, z = rz[:, :H], rz[:, H:]
        n = jnp.tanh(gx32[:, 2 * H:] + r * (gh[:, 2 * H:] + bhn))
        return (1.0 - z) * n + z * h

    def body(s, carry):
        # Forward (t = t0_f + s) and backward (t = t0_b + TC-1-s) chains are
        # independent; interleaving hides each other's MXU/EUP drain latency.
        h_f, h_b = carry

        hf_new = gru_step(gx_f_ref[s], h_f, whh_f_ref, bhn_f)
        vf = (t0_f + s) < lengths
        h_f = jnp.where(vf, hf_new, h_f)          # freeze past sequence end
        out_f_ref[s] = jnp.where(vf, h_f, 0.0)    # zero padded outputs

        sb = TC - 1 - s
        hb_new = gru_step(gx_b_ref[sb], h_b, whh_b_ref, bhn_b)
        vb = (t0_b + sb) < lengths
        h_b = jnp.where(vb, hb_new, h_b)
        out_b_ref[sb] = jnp.where(vb, h_b, 0.0)
        return h_f, h_b

    h_f, h_b = lax.fori_loop(0, TC, body, (hn_ref[0], hn_ref[1]), unroll=unroll)
    hn_ref[0] = h_f
    hn_ref[1] = h_b


def _prep_direction(x2d, T, B, H, w_ih, w_hh, b_ih, b_hh, mm_dtype):
    """Per-direction prep hoisted into XLA (runs once, off the serial chain)."""
    # Fold b_ih fully and the r/z parts of b_hh into the precomputed input
    # projection; the n-gate hidden bias stays separate (r * (W_hn h + b_hn)).
    gate_fold = jnp.concatenate([jnp.ones((2 * H,), jnp.float32),
                                 jnp.zeros((H,), jnp.float32)])
    bias = (b_ih + b_hh * gate_fold).astype(jnp.float32)
    gx = jnp.dot(x2d.astype(mm_dtype), w_ih.T.astype(mm_dtype),
                 preferred_element_type=jnp.float32) + bias   # one big MXU matmul
    gx = gx.reshape(T, B, 3 * H).astype(mm_dtype)             # bf16: halves HBM/VMEM
    whh = w_hh.T.astype(mm_dtype)                             # (H, 3H) fused RHS
    bhn = b_hh[2 * H:].reshape(1, H).astype(jnp.float32)
    return gx, whh, bhn


def encoder_rnn_forward(input_seq, input_length, params, hidden=None,
                        batch_tile=None, t_chunk=None, mm_dtype=jnp.bfloat16):
    """JAX wrapper reproducing EncoderRNN.forward.

    input_seq    : (T, B) int32
    input_length : (B,)   int32  (<= T; sorted descending like PyTorch packing)
    returns (outputs (T, B, H), hidden (2, B, H))
    """
    emb_table = params["embedding"]                          # (V, H)
    T, B = input_seq.shape
    H = emb_table.shape[1]

    # Embedding gather in XLA (data-dependent gather; not worth fusing).
    embedded = jnp.take(emb_table, input_seq, axis=0).astype(jnp.float32)
    x2d = embedded.reshape(T * B, H)

    gx_f, whh_f, bhn_f = _prep_direction(
        x2d, T, B, H, params["w_ih_f"], params["w_hh_f"],
        params["b_ih_f"], params["b_hh_f"], mm_dtype)
    gx_b, whh_b, bhn_b = _prep_direction(
        x2d, T, B, H, params["w_ih_b"], params["w_hh_b"],
        params["b_ih_b"], params["b_hh_b"], mm_dtype)

    if hidden is None:
        hidden = jnp.zeros((2, B, H), jnp.float32)
    hidden = hidden.astype(jnp.float32)
    len_col = input_length.astype(jnp.int32).reshape(B, 1)

    budget = _vmem_budget_bytes()
    mm_bytes = jnp.dtype(mm_dtype).itemsize
    auto_tb, auto_tc = _pick_tiles(T, B, H, budget, mm_bytes)
    TB = auto_tb if batch_tile is None else batch_tile
    TC = auto_tc if t_chunk is None else t_chunk
    assert B % TB == 0 and (TB == B or TB % 8 == 0), (
        "batch_tile must divide B and (unless == B) be a multiple of 8")

    # Pad T to a multiple of the chunk size; padded steps are masked out by the
    # per-(t,b) validity test and sliced off below.
    n_chunks = -(-T // TC)
    Tp = n_chunks * TC
    if Tp != T:
        pad = ((0, Tp - T), (0, 0), (0, 0))
        gx_f = jnp.pad(gx_f, pad)
        gx_b = jnp.pad(gx_b, pad)

    kernel = functools.partial(_bidir_gru_kernel,
                               unroll=_pick_unroll(TC, TB, H))
    grid = (B // TB, n_chunks)

    # TODO(synk): single-buffer the grid-invariant inputs (whh/bhn) via
    # pipeline_mode=pl.Buffered(1) to recover ~0.4 MiB on v7x's 64 MiB VMEM.
    # TODO(synk): when B // TB < 2 on v7x, expose direction as a size-2
    # "parallel" grid axis (or pl.core_map) so the second TensorCore is used.
    # TODO(synk): drive the MXU explicitly (pltpu.matmul_push_rhs once before
    # the loop, matmul_acc_lhs/matmul_pop per step) so W_hh is not re-pushed
    # into the staging registers every timestep.
    out_f, out_b, h_n = pl.pallas_call(
        kernel,
        out_shape=(jax.ShapeDtypeStruct((Tp, B, H), jnp.float32),
                   jax.ShapeDtypeStruct((Tp, B, H), jnp.float32),
                   jax.ShapeDtypeStruct((2, B, H), jnp.float32)),
        grid=grid,
        in_specs=[
            pl.BlockSpec((TC, TB, 3 * H), lambda i, c: (c, i, 0)),            # gx_f
            pl.BlockSpec((TC, TB, 3 * H),
                         lambda i, c, n=n_chunks: (n - 1 - c, i, 0)),         # gx_b (reversed T)
            pl.BlockSpec((TB, 1), lambda i, c: (i, 0)),                       # lengths
            pl.BlockSpec((2, TB, H), lambda i, c: (0, i, 0)),                 # h0
            pl.BlockSpec((H, 3 * H), lambda i, c: (0, 0)),                    # whh_f
            pl.BlockSpec((H, 3 * H), lambda i, c: (0, 0)),                    # whh_b
            pl.BlockSpec((1, H), lambda i, c: (0, 0)),                        # bhn_f
            pl.BlockSpec((1, H), lambda i, c: (0, 0)),                        # bhn_b
        ],
        out_specs=(
            pl.BlockSpec((TC, TB, H), lambda i, c: (c, i, 0)),                # out fwd
            pl.BlockSpec((TC, TB, H),
                         lambda i, c, n=n_chunks: (n - 1 - c, i, 0)),         # out bwd
            pl.BlockSpec((2, TB, H), lambda i, c: (0, i, 0)),                 # h_n (resident)
        ),
        compiler_params=pltpu.CompilerParams(
            dimension_semantics=("parallel", "arbitrary"),
            vmem_limit_bytes=budget),
    )(gx_f, gx_b, len_col, hidden, whh_f, whh_b, bhn_f, bhn_b)

    outputs = out_f[:T] + out_b[:T]   # fwd + bwd summed in the XLA epilogue
    return outputs, h_n


def _reference_forward(input_seq, input_length, params, hidden=None):
    """Pure-JAX reference (PyTorch GRU math) for correctness checking."""
    emb_table = params["embedding"]
    T, B = input_seq.shape
    H = emb_table.shape[1]
    embedded = jnp.take(emb_table, input_seq, axis=0).astype(jnp.float32)
    mask = (jnp.arange(T)[:, None] < input_length[None, :]
            ).astype(jnp.float32)[..., None]
    if hidden is None:
        hidden = jnp.zeros((2, B, H), jnp.float32)

    def cell(x, h, w_ih, w_hh, b_ih, b_hh):
        gx = x @ w_ih.T + b_ih
        gh = h @ w_hh.T + b_hh
        r = jax.nn.sigmoid(gx[:, :H] + gh[:, :H])
        z = jax.nn.sigmoid(gx[:, H:2 * H] + gh[:, H:2 * H])
        n = jnp.tanh(gx[:, 2 * H:] + r * gh[:, 2 * H:])
        return (1.0 - z) * n + z * h

    def fwd(h, xm):
        x, m = xm
        h_new = cell(x, h, params["w_ih_f"], params["w_hh_f"],
                     params["b_ih_f"], params["b_hh_f"])
        h = m * h_new + (1.0 - m) * h
        return h, m * h

    def bwd(h, xm):
        x, m = xm
        h_new = cell(x, h, params["w_ih_b"], params["w_hh_b"],
                     params["b_ih_b"], params["b_hh_b"])
        h = m * h_new + (1.0 - m) * h
        return h, m * h

    hf, out_f = lax.scan(fwd, hidden[0], (embedded, mask))
    hb, out_b_rev = lax.scan(bwd, hidden[1], (embedded[::-1], mask[::-1]))
    out = out_f + out_b_rev[::-1]
    return out, jnp.stack([hf, hb])


def init_params(key, vocab_size, hidden_size):
    ks = jax.random.split(key, 9)
    H = hidden_size
    k = 1.0 / jnp.sqrt(jnp.float32(H))
    u = lambda kk, shape: jax.random.uniform(kk, shape, jnp.float32, -k, k)
    return {
        "embedding": jax.random.normal(ks[0], (vocab_size, H), jnp.float32),
        # forward direction (PyTorch layout)
        "w_ih_f": u(ks[1], (3 * H, H)),
        "w_hh_f": u(ks[2], (3 * H, H)),
        "b_ih_f": u(ks[3], (3 * H,)),
        "b_hh_f": u(ks[4], (3 * H,)),
        # backward direction
        "w_ih_b": u(ks[5], (3 * H, H)),
        "w_hh_b": u(ks[6], (3 * H, H)),
        "b_ih_b": u(ks[7], (3 * H,)),
        "b_hh_b": u(ks[8], (3 * H,)),
    }


if __name__ == "__main__":
    key = jax.random.PRNGKey(0)
    # Lane-friendly small shapes: H multiple of 128, B multiple of 8.
    T, B, H, V = 10, 32, 128, 50

    k_param, k_seq, k_len = jax.random.split(key, 3)
    params = init_params(k_param, V, H)

    input_seq = jax.random.randint(k_seq, (T, B), 0, V, dtype=jnp.int32)
    # lengths in [1, T], sorted descending (pack_padded_sequence precondition).
    input_length = jnp.sort(
        jax.random.randint(k_len, (B,), 1, T + 1, dtype=jnp.int32))[::-1]

    ref_out, ref_h = _reference_forward(input_seq, input_length, params)

    # f32-matmul path: tight correctness check against the pure-JAX reference.
    out32, h32 = jax.block_until_ready(jax.jit(functools.partial(
        encoder_rnn_forward, params=params, mm_dtype=jnp.float32))(
            input_seq, input_length))
    assert out32.shape == (T, B, H) and h32.shape == (2, B, H)
    assert jnp.allclose(out32, ref_out, atol=1e-3, rtol=1e-3)
    assert jnp.allclose(h32, ref_h, atol=1e-3, rtol=1e-3)

    # bf16-matmul path (default / perf): recurrent bf16 rounding compounds over
    # T, so the tolerance is looser.
    out16, h16 = jax.block_until_ready(jax.jit(functools.partial(
        encoder_rnn_forward, params=params))(input_seq, input_length))
    assert out16.shape == (T, B, H) and h16.shape == (2, B, H)
    assert jnp.allclose(out16, ref_out, atol=5e-2, rtol=5e-2)
    assert jnp.allclose(h16, ref_h, atol=5e-2, rtol=5e-2)

    print("KERNEL_OK")
</pallas_src>

<mosaic_0001>
module attributes {stable_mosaic.version = 11 : i64} {
  func.func @_bidir_gru_kernel(%arg0: i32, %arg1: i32, %arg2: memref<10x32x384xf32, #tpu.memory_space<vmem>>, %arg3: memref<10x32x384xf32, #tpu.memory_space<vmem>>, %arg4: memref<32x1xi32, #tpu.memory_space<vmem>>, %arg5: memref<2x32x128xf32, #tpu.memory_space<vmem>>, %arg6: memref<128x384xf32, #tpu.memory_space<vmem>>, %arg7: memref<128x384xf32, #tpu.memory_space<vmem>>, %arg8: memref<1x128xf32, #tpu.memory_space<vmem>>, %arg9: memref<1x128xf32, #tpu.memory_space<vmem>>, %arg10: memref<10x32x128xf32, #tpu.memory_space<vmem>>, %arg11: memref<10x32x128xf32, #tpu.memory_space<vmem>>, %arg12: memref<2x32x128xf32, #tpu.memory_space<vmem>>) attributes {dimension_semantics = [#tpu.dimension_semantics<parallel>, #tpu.dimension_semantics<arbitrary>], iteration_bounds = array<i64: 1, 1>, scalar_prefetch = 0 : i64, scratch_operands = 0 : i64, tpu.core_type = #tpu.core_type<tc>, window_params = [{transform_indices = @transform_0, window_bounds = array<i64: 10, 32, 384>}, {transform_indices = @transform_1, window_bounds = array<i64: 10, 32, 384>}, {transform_indices = @transform_2, window_bounds = array<i64: 32, 1>}, {transform_indices = @transform_3, window_bounds = array<i64: 2, 32, 128>}, {pipeline_mode = #tpu.pipeline_mode<synchronous>, transform_indices = @transform_4, window_bounds = array<i64: 128, 384>}, {pipeline_mode = #tpu.pipeline_mode<synchronous>, transform_indices = @transform_5, window_bounds = array<i64: 128, 384>}, {pipeline_mode = #tpu.pipeline_mode<synchronous>, transform_indices = @transform_6, window_bounds = array<i64: 1, 128>}, {pipeline_mode = #tpu.pipeline_mode<synchronous>, transform_indices = @transform_7, window_bounds = array<i64: 1, 128>}, {transform_indices = @transform_8, window_bounds = array<i64: 10, 32, 128>}, {transform_indices = @transform_9, window_bounds = array<i64: 10, 32, 128>}, {transform_indices = @transform_10, window_bounds = array<i64: 2, 32, 128>}]} {
    %c10_i32 = arith.constant 10 : i32
    %0 = arith.muli %arg1, %c10_i32 : i32
    %c0_i32 = arith.constant 0 : i32
    %1 = arith.subi %c0_i32, %arg1 : i32
    %c10_i32_0 = arith.constant 10 : i32
    %2 = arith.muli %1, %c10_i32_0 : i32
    %c0_i32_1 = arith.constant 0 : i32
    %3 = arith.cmpi eq, %arg1, %c0_i32_1 : i32
    %4 = arith.extui %3 : i1 to i32
    %c0_i32_2 = arith.constant 0 : i32
    %5 = arith.cmpi ne, %4, %c0_i32_2 : i32
    scf.if %5 {
      %c0_22 = arith.constant 0 : index
      %c0_23 = arith.constant 0 : index
      %c0_24 = arith.constant 0 : index
      %21 = vector.load %arg5[%c0_22, %c0_23, %c0_24] : memref<2x32x128xf32, #tpu.memory_space<vmem>>, vector<2x32x128xf32>
      %c0_25 = arith.constant 0 : index
      %c0_26 = arith.constant 0 : index
      %c0_27 = arith.constant 0 : index
      %22 = vector.load %arg12[%c0_25, %c0_26, %c0_27] : memref<2x32x128xf32, #tpu.memory_space<vmem>>, vector<2x32x128xf32>
      tpu.vector_store %arg12[%c0_25, %c0_26, %c0_27], %21 {strides = array<i32>} : memref<2x32x128xf32, #tpu.memory_space<vmem>>, vector<2x32x128xf32>,
    } else {
    }
    %c0 = arith.constant 0 : index
    %c0_3 = arith.constant 0 : index
    %6 = vector.load %arg4[%c0, %c0_3] : memref<32x1xi32, #tpu.memory_space<vmem>>, vector<32x1xi32>
    %c0_4 = arith.constant 0 : index
    %c0_5 = arith.constant 0 : index
    %7 = vector.load %arg8[%c0_4, %c0_5] : memref<1x128xf32, #tpu.memory_space<vmem>>, vector<1x128xf32>
    %c0_6 = arith.constant 0 : index
    %c0_7 = arith.constant 0 : index
    %8 = vector.load %arg9[%c0_6, %c0_7] : memref<1x128xf32, #tpu.memory_space<vmem>>, vector<1x128xf32>
    %c0_8 = arith.constant 0 : index
    %c0_9 = arith.constant 0 : index
    %c0_10 = arith.constant 0 : index
    %9 = vector.load %arg12[%c0_8, %c0_9, %c0_10] : memref<2x32x128xf32, #tpu.memory_space<vmem>>, vector<1x32x128xf32>
    %10 = vector.shape_cast %9 : vector<1x32x128xf32> to vector<32x128xf32>
    %c1 = arith.constant 1 : index
    %c0_11 = arith.constant 0 : index
    %c0_12 = arith.constant 0 : index
    %11 = vector.load %arg12[%c1, %c0_11, %c0_12] : memref<2x32x128xf32, #tpu.memory_space<vmem>>, vector<1x32x128xf32>
    %12 = vector.shape_cast %11 : vector<1x32x128xf32> to vector<32x128xf32>
    %c0_i32_13 = arith.constant 0 : i32
    %c10_i32_14 = arith.constant 10 : i32
    %13 = arith.addi %c0_i32_13, %c10_i32_14 : i32
    %c1_i32 = arith.constant 1 : i32
    %14:2 = scf.for %arg13 = %c0_i32_13 to %13 step %c1_i32 iter_args(%arg14 = %10, %arg15 = %12) -> (vector<32x128xf32>, vector<32x128xf32>)  : i32 {
      %21 = arith.index_cast %arg13 : i32 to index
      %c0_22 = arith.constant 0 : index
      %c0_23 = arith.constant 0 : index
      %22 = vector.load %arg2[%21, %c0_22, %c0_23] : memref<10x32x384xf32, #tpu.memory_space<vmem>>, vector<1x32x384xf32>
      %23 = vector.shape_cast %22 : vector<1x32x384xf32> to vector<32x384xf32>
      %c0_24 = arith.constant 0 : index
      %c0_25 = arith.constant 0 : index
      %24 = vector.load %arg6[%c0_24, %c0_25] : memref<128x384xf32, #tpu.memory_space<vmem>>, vector<128x384xf32>
      %cst = arith.constant dense<0.000000e+00> : vector<32x384xf32>
      %25 = tpu.matmul %arg14, %24, %cst {dimension_numbers = #tpu.dot_dimension_numbers<[1], [0], [0], [1], [0, 0, 1, 1], [], []>} : vector<32x128xf32>, vector<128x384xf32>, vector<32x384xf32> -> vector<32x384xf32>
      %26 = vector.extract_strided_slice %23 {offsets = [0, 0], sizes = [32, 256], strides = [1, 1]} : vector<32x384xf32> to vector<32x256xf32>
      %27 = vector.extract_strided_slice %25 {offsets = [0, 0], sizes = [32, 256], strides = [1, 1]} : vector<32x384xf32> to vector<32x256xf32>
      %28 = arith.addf %26, %27 : vector<32x256xf32>
      %cst_26 = arith.constant 5.000000e-01 : f32
      %29 = vector.broadcast %cst_26 : f32 to vector<32x256xf32>
      %30 = arith.mulf %29, %28 : vector<32x256xf32>
      %31 = math.tanh %30 : vector<32x256xf32>
      %cst_27 = arith.constant 5.000000e-01 : f32
      %32 = vector.broadcast %cst_27 : f32 to vector<32x256xf32>
      %33 = arith.mulf %32, %31 : vector<32x256xf32>
      %cst_28 = arith.constant 5.000000e-01 : f32
      %34 = vector.broadcast %cst_28 : f32 to vector<32x256xf32>
      %35 = arith.addf %33, %34 : vector<32x256xf32>
      %36 = vector.extract_strided_slice %35 {offsets = [0, 0], sizes = [32, 128], strides = [1, 1]} : vector<32x256xf32> to vector<32x128xf32>
      %37 = vector.extract_strided_slice %35 {offsets = [0, 128], sizes = [32, 128], strides = [1, 1]} : vector<32x256xf32> to vector<32x128xf32>
      %38 = vector.extract_strided_slice %23 {offsets = [0, 256], sizes = [32, 128], strides = [1, 1]} : vector<32x384xf32> to vector<32x128xf32>
      %39 = vector.extract_strided_slice %25 {offsets = [0, 256], sizes = [32, 128], strides = [1, 1]} : vector<32x384xf32> to vector<32x128xf32>
      %40 = vector.broadcast %7 : vector<1x128xf32> to vector<32x128xf32>
      %41 = arith.addf %39, %40 : vector<32x128xf32>
      %42 = arith.mulf %36, %41 : vector<32x128xf32>
      %43 = arith.addf %38, %42 : vector<32x128xf32>
      %44 = math.tanh %43 : vector<32x128xf32>
      %cst_29 = arith.constant 1.000000e+00 : f32
      %45 = vector.broadcast %cst_29 : f32 to vector<32x128xf32>
      %46 = arith.subf %45, %37 : vector<32x128xf32>
      %47 = arith.mulf %46, %44 : vector<32x128xf32>
      %48 = arith.mulf %37, %arg14 : vector<32x128xf32>
      %49 = arith.addf %47, %48 : vector<32x128xf32>
      %50 = arith.addi %0, %arg13 : i32
      %51 = vector.broadcast %50 : i32 to vector<32x1xi32>
      %52 = arith.cmpi slt, %51, %6 : vector<32x1xi32>
      %53 = vector.shape_cast %52 : vector<32x1xi1> to vector<32x1xi1>
      %54 = vector.broadcast %53 : vector<32x1xi1> to vector<32x128xi1>
      %55 = arith.select %54, %49, %arg14 : vector<32x128xi1>, vector<32x128xf32>
      %cst_30 = arith.constant 0.000000e+00 : f32
      %56 = vector.shape_cast %52 : vector<32x1xi1> to vector<32x1xi1>
      %57 = vector.broadcast %56 : vector<32x1xi1> to vector<32x128xi1>
      %58 = vector.broadcast %cst_30 : f32 to vector<32x128xf32>
      %59 = arith.select %57, %55, %58 : vector<32x128xi1>, vector<32x128xf32>
      %60 = arith.index_cast %arg13 : i32 to index
      %c0_31 = arith.constant 0 : index
      %c0_32 = arith.constant 0 : index
      %61 = vector.load %arg10[%60, %c0_31, %c0_32] : memref<10x32x128xf32, #tpu.memory_space<vmem>>, vector<1x32x128xf32>
      %62 = vector.shape_cast %61 : vector<1x32x128xf32> to vector<32x128xf32>
      %63 = vector.shape_cast %59 : vector<32x128xf32> to vector<1x32x128xf32>
      tpu.vector_store %arg10[%60, %c0_31, %c0_32], %63 {strides = array<i32>} : memref<10x32x128xf32, #tpu.memory_space<vmem>>, vector<1x32x128xf32>,
      %c9_i32 = arith.constant 9 : i32
      %64 = arith.subi %c9_i32, %arg13 : i32
      %65 = arith.index_cast %64 : i32 to index
      %c0_33 = arith.constant 0 : index
      %c0_34 = arith.constant 0 : index
      %66 = vector.load %arg3[%65, %c0_33, %c0_34] : memref<10x32x384xf32, #tpu.memory_space<vmem>>, vector<1x32x384xf32>
      %67 = vector.shape_cast %66 : vector<1x32x384xf32> to vector<32x384xf32>
      %c0_35 = arith.constant 0 : index
      %c0_36 = arith.constant 0 : index
      %68 = vector.load %arg7[%c0_35, %c0_36] : memref<128x384xf32, #tpu.memory_space<vmem>>, vector<128x384xf32>
      %cst_37 = arith.constant dense<0.000000e+00> : vector<32x384xf32>
      %69 = tpu.matmul %arg15, %68, %cst_37 {dimension_numbers = #tpu.dot_dimension_numbers<[1], [0], [0], [1], [0, 0, 1, 1], [], []>} : vector<32x128xf32>, vector<128x384xf32>, vector<32x384xf32> -> vector<32x384xf32>
      %70 = vector.extract_strided_slice %67 {offsets = [0, 0], sizes = [32, 256], strides = [1, 1]} : vector<32x384xf32> to vector<32x256xf32>
      %71 = vector.extract_strided_slice %69 {offsets = [0, 0], sizes = [32, 256], strides = [1, 1]} : vector<32x384xf32> to vector<32x256xf32>
      %72 = arith.addf %70, %71 : vector<32x256xf32>
      %cst_38 = arith.constant 5.000000e-01 : f32
      %73 = vector.broadcast %cst_38 : f32 to vector<32x256xf32>
      %74 = arith.mulf %73, %72 : vector<32x256xf32>
      %75 = math.tanh %74 : vector<32x256xf32>
      %cst_39 = arith.constant 5.000000e-01 : f32
      %76 = vector.broadcast %cst_39 : f32 to vector<32x256xf32>
      %77 = arith.mulf %76, %75 : vector<32x256xf32>
      %cst_40 = arith.constant 5.000000e-01 : f32
      %78 = vector.broadcast %cst_40 : f32 to vector<32x256xf32>
      %79 = arith.addf %77, %78 : vector<32x256xf32>
      %80 = vector.extract_strided_slice %79 {offsets = [0, 0], sizes = [32, 128], strides = [1, 1]} : vector<32x256xf32> to vector<32x128xf32>
      %81 = vector.extract_strided_slice %79 {offsets = [0, 128], sizes = [32, 128], strides = [1, 1]} : vector<32x256xf32> to vector<32x128xf32>
      %82 = vector.extract_strided_slice %67 {offsets = [0, 256], sizes = [32, 128], strides = [1, 1]} : vector<32x384xf32> to vector<32x128xf32>
      %83 = vector.extract_strided_slice %69 {offsets = [0, 256], sizes = [32, 128], strides = [1, 1]} : vector<32x384xf32> to vector<32x128xf32>
      %84 = vector.broadcast %8 : vector<1x128xf32> to vector<32x128xf32>
      %85 = arith.addf %83, %84 : vector<32x128xf32>
      %86 = arith.mulf %80, %85 : vector<32x128xf32>
      %87 = arith.addf %82, %86 : vector<32x128xf32>
      %88 = math.tanh %87 : vector<32x128xf32>
      %cst_41 = arith.constant 1.000000e+00 : f32
      %89 = vector.broadcast %cst_41 : f32 to vector<32x128xf32>
      %90 = arith.subf %89, %81 : vector<32x128xf32>
      %91 = arith.mulf %90, %88 : vector<32x128xf32>
      %92 = arith.mulf %81, %arg15 : vector<32x128xf32>
      %93 = arith.addf %91, %92 : vector<32x128xf32>
      %94 = arith.addi %2, %64 : i32
      %95 = vector.broadcast %94 : i32 to vector<32x1xi32>
      %96 = arith.cmpi slt, %95, %6 : vector<32x1xi32>
      %97 = vector.shape_cast %96 : vector<32x1xi1> to vector<32x1xi1>
      %98 = vector.broadcast %97 : vector<32x1xi1> to vector<32x128xi1>
      %99 = arith.select %98, %93, %arg15 : vector<32x128xi1>, vector<32x128xf32>
      %cst_42 = arith.constant 0.000000e+00 : f32
      %100 = vector.shape_cast %96 : vector<32x1xi1> to vector<32x1xi1>
      %101 = vector.broadcast %100 : vector<32x1xi1> to vector<32x128xi1>
      %102 = vector.broadcast %cst_42 : f32 to vector<32x128xf32>
      %103 = arith.select %101, %99, %102 : vector<32x128xi1>, vector<32x128xf32>
      %104 = arith.index_cast %64 : i32 to index
      %c0_43 = arith.constant 0 : index
      %c0_44 = arith.constant 0 : index
      %105 = vector.load %arg11[%104, %c0_43, %c0_44] : memref<10x32x128xf32, #tpu.memory_space<vmem>>, vector<1x32x128xf32>
      %106 = vector.shape_cast %105 : vector<1x32x128xf32> to vector<32x128xf32>
      %107 = vector.shape_cast %103 : vector<32x128xf32> to vector<1x32x128xf32>
      tpu.vector_store %arg11[%104, %c0_43, %c0_44], %107 {strides = array<i32>} : memref<10x32x128xf32, #tpu.memory_space<vmem>>, vector<1x32x128xf32>,
      scf.yield %55, %99 : vector<32x128xf32>, vector<32x128xf32>
    }
    %c10_i32_15 = arith.constant 10 : i32
    %c0_16 = arith.constant 0 : index
    %c0_17 = arith.constant 0 : index
    %c0_18 = arith.constant 0 : index
    %15 = vector.load %arg12[%c0_16, %c0_17, %c0_18] : memref<2x32x128xf32, #tpu.memory_space<vmem>>, vector<1x32x128xf32>
    %16 = vector.shape_cast %15 : vector<1x32x128xf32> to vector<32x128xf32>
    %17 = vector.shape_cast %14#0 : vector<32x128xf32> to vector<1x32x128xf32>
    tpu.vector_store %arg12[%c0_16, %c0_17, %c0_18], %17 {strides = array<i32>} : memref<2x32x128xf32, #tpu.memory_space<vmem>>, vector<1x32x128xf32>,
    %c1_19 = arith.constant 1 : index
    %c0_20 = arith.constant 0 : index
    %c0_21 = arith.constant 0 : index
    %18 = vector.load %arg12[%c1_19, %c0_20, %c0_21] : memref<2x32x128xf32, #tpu.memory_space<vmem>>, vector<1x32x128xf32>
    %19 = vector.shape_cast %18 : vector<1x32x128xf32> to vector<32x128xf32>
    %20 = vector.shape_cast %14#1 : vector<32x128xf32> to vector<1x32x128xf32>
    tpu.vector_store %arg12[%c1_19, %c0_20, %c0_21], %20 {strides = array<i32>} : memref<2x32x128xf32, #tpu.memory_space<vmem>>, vector<1x32x128xf32>,
    return
  }
  func.func @transform_0(%arg0: i32, %arg1: i32) -> (i32, i32, i32) {
    %c0_i32 = arith.constant 0 : i32
    %c0_i32_0 = arith.constant 0 : i32
    return %arg1, %arg0, %c0_i32 : i32, i32, i32
  }
  func.func @transform_1(%arg0: i32, %arg1: i32) -> (i32, i32, i32) {
    %c0_i32 = arith.constant 0 : i32
    %0 = arith.subi %c0_i32, %arg1 : i32
    %c0_i32_0 = arith.constant 0 : i32
    %c0_i32_1 = arith.constant 0 : i32
    return %0, %arg0, %c0_i32_0 : i32, i32, i32
  }
  func.func @transform_2(%arg0: i32, %arg1: i32) -> (i32, i32) {
    %c0_i32 = arith.constant 0 : i32
    %c0_i32_0 = arith.constant 0 : i32
    return %arg0, %c0_i32 : i32, i32
  }
  func.func @transform_3(%arg0: i32, %arg1: i32) -> (i32, i32, i32) {
    %c0_i32 = arith.constant 0 : i32
    %c0_i32_0 = arith.constant 0 : i32
    %c0_i32_1 = arith.constant 0 : i32
    return %c0_i32, %arg0, %c0_i32_0 : i32, i32, i32
  }
  func.func @transform_4(%arg0: i32, %arg1: i32) -> (i32, i32) {
    %c0_i32 = arith.constant 0 : i32
    %c0_i32_0 = arith.constant 0 : i32
    %c0_i32_1 = arith.constant 0 : i32
    return %c0_i32, %c0_i32_0 : i32, i32
  }
  func.func @transform_5(%arg0: i32, %arg1: i32) -> (i32, i32) {
    %c0_i32 = arith.constant 0 : i32
    %c0_i32_0 = arith.constant 0 : i32
    %c0_i32_1 = arith.constant 0 : i32
    return %c0_i32, %c0_i32_0 : i32, i32
  }
  func.func @transform_6(%arg0: i32, %arg1: i32) -> (i32, i32) {
    %c0_i32 = arith.constant 0 : i32
    %c0_i32_0 = arith.constant 0 : i32
    %c0_i32_1 = arith.constant 0 : i32
    return %c0_i32, %c0_i32_0 : i32, i32
  }
  func.func @transform_7(%arg0: i32, %arg1: i32) -> (i32, i32) {
    %c0_i32 = arith.constant 0 : i32
    %c0_i32_0 = arith.constant 0 : i32
    %c0_i32_1 = arith.constant 0 : i32
    return %c0_i32, %c0_i32_0 : i32, i32
  }
  func.func @transform_8(%arg0: i32, %arg1: i32) -> (i32, i32, i32) {
    %c0_i32 = arith.constant 0 : i32
    %c0_i32_0 = arith.constant 0 : i32
    return %arg1, %arg0, %c0_i32 : i32, i32, i32
  }
  func.func @transform_9(%arg0: i32, %arg1: i32) -> (i32, i32, i32) {
    %c0_i32 = arith.constant 0 : i32
    %0 = arith.subi %c0_i32, %arg1 : i32
    %c0_i32_0 = arith.constant 0 : i32
    %c0_i32_1 = arith.constant 0 : i32
    return %0, %arg0, %c0_i32_0 : i32, i32, i32
  }
  func.func @transform_10(%arg0: i32, %arg1: i32) -> (i32, i32, i32) {
    %c0_i32 = arith.constant 0 : i32
    %c0_i32_0 = arith.constant 0 : i32
    %c0_i32_1 = arith.constant 0 : i32
    return %c0_i32, %arg0, %c0_i32_0 : i32, i32, i32
  }
}

</mosaic_0001>

<bundles_post_ra>
// kernel: encoder_rnn_forward.1
= control target key start
LH: loop header
LB: loop body
LE: loop exit
PB: predicated region body
PF: predicated region fallthrough
CT: control target
= control target key end

     0   :  { %16 = vsyncpa [#allocation3], 0  ;;  %s2041_s0 = inlined_call_operand.vmem [shape: f32[10,32,384], index: 0, kind: input, shape index: {}]   ;;  %s2042_s1 = inlined_call_operand.vmem [shape: f32[10,32,384], index: 1, kind: input, shape index: {}]   ;;  %s2043_s2 = inlined_call_operand.vmem [shape: s32[32,1], index: 2, kind: input, shape index: {}]   ;;  %s2044_s3 = inlined_call_operand.vmem [shape: f32[2,32,128], index: 3, kind: input, shape index: {}]   ;;  %s2045_s4 = inlined_call_operand.vmem [shape: f32[128,384], index: 4, kind: input, shape index: {}]   ;;  %s2046_s5 = inlined_call_operand.vmem [shape: f32[128,384], index: 5, kind: input, shape index: {}]   ;;  %s2047_s6 = inlined_call_operand.vmem [shape: f32[1,128], index: 6, kind: input, shape index: {}]   ;;  %s2048_s7 = inlined_call_operand.vmem [shape: f32[1,128], index: 7, kind: input, shape index: {}]   ;;  %s2049_s8 = inlined_call_operand.vmem [shape: f32[10,32,128], index: 8, kind: output, shape index: {0}]   ;;  %s2050_s9 = inlined_call_operand.vmem [shape: f32[10,32,128], index: 9, kind: output, shape index: {1}]   ;;  %s2051_s10 = inlined_call_operand.hbm [shape: f32[2,32,128], index: 10, kind: output, shape index: {2}]  }
   0x1   :  { %v81_v0 = vld [vmem:[%s2044_s3] sm:$0xff]   ;;  %v82_v1 = vld [vmem:[%s2044_s3 + $0x8] sm:$0xff]   ;;  %v83_v2 = vld [vmem:[%s2044_s3 + $0x10] sm:$0xff]  }
   0x2   :  { %89 = vst [vmem:[#allocation2] sm:$0xff] %v81_v0  ;;  %90 = vst [vmem:[#allocation2 + $0x8] sm:$0xff] %v82_v1  ;;  %v84_v3 = vld [vmem:[%s2044_s3 + $0x18] sm:$0xff]   ;;  %v85_v4 = vld [vmem:[%s2044_s3 + $0x20] sm:$0xff]  }
   0x3   :  { %91 = vst [vmem:[#allocation2 + $0x10] sm:$0xff] %v83_v2  ;;  %92 = vst [vmem:[#allocation2 + $0x18] sm:$0xff] %v84_v3  ;;  %v86_v5 = vld [vmem:[%s2044_s3 + $0x28] sm:$0xff]   ;;  %v87_v6 = vld [vmem:[%s2044_s3 + $0x30] sm:$0xff]  }
   0x4   :  { %93 = vst [vmem:[#allocation2 + $0x20] sm:$0xff] %v85_v4  ;;  %v88_v7 = vld [vmem:[%s2044_s3 + $0x38] sm:$0xff]   ;;  %94 = vst [vmem:[#allocation2 + $0x28] sm:$0xff] %v86_v5  ;;  %v1498_v8 = vld [vmem:[%s2043_s2] sm:$0xff] }
   0x5   :  { %95 = vst [vmem:[#allocation2 + $0x30] sm:$0xff] %v87_v6  ;;  %96 = vst [vmem:[#allocation2 + $0x38] sm:$0xff] %v88_v7  ;;  %v1503_v9 = vld [vmem:[%s2043_s2 + $0x8] sm:$0xff]  ;;  %v1508_v10 = vld [vmem:[%s2043_s2 + $0x10] sm:$0xff] }
   0x6   :  { %v1513_v11 = vld [vmem:[%s2043_s2 + $0x18] sm:$0xff]  ;;  %v1518_v12 = vld [vmem:[%s2047_s6] ss:$0 sm:$0xff]  ;;  %s1541_s2 = smov 0  }
   0x7   :  { %v1523_v13 = vld [vmem:[%s2048_s7] ss:$0 sm:$0xff] }
   0x8 LB: > { %v142_v14 = vld [vmem:[%s2045_s4 + $0x8] sm:$0xff]  ;;  %v145_v15 = vld [vmem:[%s2045_s4 + $0x20] sm:$0xff]  ;;  %v144_v18 = vld [vmem:[%s2045_s4 + $0x18] sm:$0xff]  ;;  %v1411_v21 = vmov 0.0   ;;  %1016 = vmatprep.mubr.f32.mxu1 %v1405_v0  ;;  %v1412_v36 = vmov 0   ;;  %v442_v37 = vstv %s1409_s2  ;;  %s1624_s27 = ssub.s32 9, %s1409_s2  ;;  %s1409_s2 = sphi %s1541_s2, %s117_s2   ;;  %v1405_v0 = vphi %v81_v0, %v2063_v0   ;;  %v1401_v1 = vphi %v82_v1, %v2062_v1   ;;  %v1397_v2 = vphi %v83_v2, %v2061_v2   ;;  %v1393_v3 = vphi %v84_v3, %v2060_v3   ;;  %v1389_v4 = vphi %v85_v4, %v2059_v4   ;;  %v1385_v5 = vphi %v86_v5, %v2058_v5   ;;  %v1381_v6 = vphi %v87_v6, %v2057_v6   ;;  %v1377_v7 = vphi %v88_v7, %v2056_v7  }
   0x9   : > { %v141_v16 = vld [vmem:[%s2045_s4] sm:$0xff]  ;;  %v1060_v17 = vpack.c.bf16 %v145_v15, %v142_v14  ;;  %v148_v19 = vld [vmem:[%s2045_s4 + $0x38] sm:$0xff]  ;;  %v151_v20 = vld [vmem:[%s2045_s4 + $0x50] sm:$0xff]  ;;  %253 = vmatprep.mubr.f32.mxu0 %v1411_v21  ;;  %1265 = vset.pattern.permute.xlu0 %v1412_v36  ;;  %vm443_vm0 = vcmp.lt.s32.totalorder %v442_v37, %v1498_v8  ;;  %vm445_vm1 = vcmp.lt.s32.totalorder %v442_v37, %v1508_v10  ;;  %v798_v49 = vstv %s1624_s27  ;;  %s942_s14 = smul.u32 96, %s1409_s2  ;;  %s938_s7 = sshll.u32 %s1409_s2, 5 }
   0xa   : > { %v1062_v22 = vpack.c.bf16 %v144_v18, %v141_v16  ;;  %v1064_v23 = vpack.c.bf16 %v151_v20, %v148_v19  ;;  %v147_v24 = vld [vmem:[%s2045_s4 + $0x30] sm:$0xff]  ;;  %v150_v25 = vld [vmem:[%s2045_s4 + $0x48] sm:$0xff]  ;;  %v157_v27 = vld [vmem:[%s2045_s4 + $0x80] sm:$0xff]  ;;  %1266 = vset.pattern.permute.xlu1 %v1412_v36  ;;  %v447_v43 = vsel %vm443_vm0, 1, %v1412_v36  ;;  %vm444_vm2 = vcmp.lt.s32.totalorder %v442_v37, %v1503_v9  ;;  %s943_s17 = smul.u32 96, %s1624_s27  ;;  %s1943_s22 = scalar_lea.vmem %s2049_s8, %s938_s7 }
   0xb   : > { %v154_v26 = vld [vmem:[%s2045_s4 + $0x68] sm:$0xff]  ;;  %1061 = vmatprep.subr.bf16.mxu0 %v1060_v17  ;;  %v1066_v28 = vpack.c.bf16 %v150_v25, %v147_v24  ;;  %v153_v29 = vld [vmem:[%s2045_s4 + $0x60] sm:$0xff]  ;;  %v156_v31 = vld [vmem:[%s2045_s4 + $0x78] sm:$0xff]  ;;  %v449_v48 = vsel %vm445_vm1, 1, %v1412_v36  ;;  %vm446_vm3 = vcmp.lt.s32.totalorder %v442_v37, %v1513_v11  ;;  %452 = vperm.xlu0 %1265, %v447_v43   ;;  %v448_v54 = vsel %vm444_vm2, 1, %v1412_v36  ;;  %s1911_s16 = scalar_lea.vmem %s2041_s0, %s942_s14  ;;  %s941_s23 = sshll.u32 %s1624_s27, 5 }
   0xc   : > { %1063 = vmatpush1.bf16.msra.mxu0 %v1062_v22  ;;  %v1068_v30 = vpack.c.bf16 %v157_v27, %v154_v26  ;;  %v160_v32 = vld [vmem:[%s2045_s4 + $0x98] sm:$0xff]  ;;  %v163_v33 = vld [vmem:[%s2045_s4 + $0xb0] sm:$0xff]  ;;  %v146_v35 = vld [vmem:[%s2045_s4 + $0x28] sm:$0xff]  ;;  %v1070_v39 = vpack.c.bf16 %v156_v31, %v153_v29  ;;  %458 = vperm.xlu1 %1266, %v449_v48   ;;  %v450_v58 = vsel %vm446_vm3, 1, %v1412_v36  ;;  %vm799_vm4 = vcmp.lt.s32.totalorder %v798_v49, %v1498_v8  ;;  %s1930_s6 = scalar_lea.vmem %s2042_s1, %s943_s17  ;;  %s1989_s26 = scalar_lea.vmem %s2050_s9, %s941_s23 }
   0xd   : > { %1065 = vmatprep.subr.bf16.mxu0 %v1064_v23  ;;  %v143_v34 = vld [vmem:[%s2045_s4 + $0x10] sm:$0xff]  ;;  %v1072_v40 = vpack.c.bf16 %v163_v33, %v160_v32  ;;  %v149_v41 = vld [vmem:[%s2045_s4 + $0x40] sm:$0xff]  ;;  %v152_v42 = vld [vmem:[%s2045_s4 + $0x58] sm:$0xff]  ;;  %vm800_vm5 = vcmp.lt.s32.totalorder %v798_v49, %v1503_v9  ;;  %v803_v15 = vsel %vm799_vm4, 1, %v1412_v36  ;;  %vm801_vm6 = vcmp.lt.s32.totalorder %v798_v49, %v1508_v10  ;;  %s117_s2 = sadd.s32 1, %s1409_s2  }
   0xe   : > { %v1092_v38 = vpack.c.bf16 %v146_v35, %v143_v34  ;;  %v159_v44 = vld [vmem:[%s2045_s4 + $0x90] sm:$0xff]  ;;  %v162_v45 = vld [vmem:[%s2045_s4 + $0xa8] sm:$0xff]  ;;  %v1096_v47 = vpack.c.bf16 %v152_v42, %v149_v41  ;;  %v169_v50 = vld [vmem:[%s2045_s4 + $0xe0] sm:$0xff]  ;;  %v804_v19 = vsel %vm800_vm5, 1, %v1412_v36  ;;  %vm802_vm7 = vcmp.lt.s32.totalorder %v798_v49, %v1513_v11  ;;  %p114_p0 = scmp.ge.s32.totalorder %s117_s2, 10  }
   0xf   : > { %v166_v46 = vld [vmem:[%s2045_s4 + $0xc8] sm:$0xff]  ;;  %v155_v51 = vld [vmem:[%s2045_s4 + $0x70] sm:$0xff]  ;;  %v1074_v55 = vpack.c.bf16 %v162_v45, %v159_v44  ;;  %v161_v56 = vld [vmem:[%s2045_s4 + $0xa0] sm:$0xff]  ;;  %455 = vperm.xlu0 %1265, %v448_v54   ;;  %v805_v27 = vsel %vm801_vm6, 1, %v1412_v36  ;;  %v806_v31 = vsel %vm802_vm7, 1, %v1412_v36  ;;  %s1413_s27 = smov (%p114_p0), [#allocation2]  }
  0x10   : > { %1067 = vmatpush1.bf16.msra.mxu0 %v1066_v28  ;;  %1093 = vmatprep.subr.bf16.mxu1 %v1092_v38  ;;  %v158_v52 = vld [vmem:[%s2045_s4 + $0x88] sm:$0xff]  ;;  %v164_v57 = vld [vmem:[%s2045_s4 + $0xb8] sm:$0xff]  ;;  %v1076_v59 = vpack.c.bf16 %v169_v50, %v166_v46  ;;  %v165_v60 = vld [vmem:[%s2045_s4 + $0xc0] sm:$0xff]  ;;  %s863_s28 = sshll.u32 (%p114_p0), %s1413_s27, 4  ;;  %s864_s28 = int_to_ptr.vmem [resolvable:$true] %s863_s28 }
  0x11   : > { %1069 = vmatprep.subr.bf16.mxu0 %v1068_v30  ;;  %1095 = vmatpush3.bf16.msra.mxu1 %v1092_v38  ;;  %v1100_v53 = vpack.c.bf16 %v158_v52, %v155_v51  ;;  %v168_v61 = vld [vmem:[%s2045_s4 + $0xd8] sm:$0xff]  ;;  %v175_v63 = vld [vmem:[%s2045_s4 + $0x110] sm:$0xff]  ;;  %v1104_v14 = vpack.c.bf16 %v164_v57, %v161_v56  ;;  %v170_v18 = vld [vmem:[%s2045_s4 + $0xe8] sm:$0xff]  ;;  %s1315_s29 = scalar_lea.vmem (%p114_p0), %s864_s28, 1024  ;;  %p1320_p2 = scmp.lt.s32.totalorder (%p114_p0), %s864_s28, %s864_s28 }
  0x12   : > { %1097 = vmatprep.subr.bf16.mxu1 %v1096_v47  ;;  %v172_v62 = vld [vmem:[%s2045_s4 + $0xf8] sm:$0xff]  ;;  %461 = vperm.xlu1 %1266, %v450_v58   ;;  %v1078_v16 = vpack.c.bf16 %v168_v61, %v165_v60  ;;  %v167_v17 = vld [vmem:[%s2045_s4 + $0xd0] sm:$0xff]  ;;  %v174_v23 = vld [vmem:[%s2045_s4 + $0x108] sm:$0xff]  ;;  %p1316_p1 = scmp.ne.s32.totalorder (%p114_p0), %s864_s28, %s1315_s29  ;;  %p1321_p3 = scmp.lt.s32.totalorder (%p114_p0), %s1315_s29, %s1315_s29 }
  0x13   : > { %v1080_v20 = vpack.c.bf16 %v175_v63, %v172_v62  ;;  %v171_v22 = vld [vmem:[%s2045_s4 + $0xf0] sm:$0xff]  ;;  %v178_v24 = vld [vmem:[%s2045_s4 + $0x128] sm:$0xff]  ;;  %v181_v25 = vld [vmem:[%s2045_s4 + $0x140] sm:$0xff]  ;;  %808 = vperm.xlu0 %1265, %v803_v15   ;;  %v1108_v26 = vpack.c.bf16 %v170_v18, %v167_v17 }
  0x14   : > { %1071 = vmatpush1.bf16.msra.mxu0 %v1070_v39  ;;  %v1082_v28 = vpack.c.bf16 %v174_v23, %v171_v22  ;;  %v173_v29 = vld [vmem:[%s2045_s4 + $0x100] sm:$0xff]  ;;  %v176_v30 = vld [vmem:[%s2045_s4 + $0x118] sm:$0xff]  ;;  %v1084_v32 = vpack.c.bf16 %v181_v25, %v178_v24  ;;  %v187_v37 = vld [vmem:[%s2045_s4 + $0x170] sm:$0xff]  ;;  %p1322_p4 = por (%p114_p0), %p1321_p3, %p1320_p2 }
  0x15   : > { %1073 = vmatprep.subr.bf16.mxu0 %v1072_v40  ;;  %1099 = vmatpush3.bf16.msra.mxu1 %v1096_v47  ;;  %v177_v33 = vld [vmem:[%s2045_s4 + $0x120] sm:$0xff]  ;;  %v180_v34 = vld [vmem:[%s2045_s4 + $0x138] sm:$0xff]  ;;  %v1112_v36 = vpack.c.bf16 %v176_v30, %v173_v29  ;;  %v179_v39 = vld [vmem:[%s2045_s4 + $0x130] sm:$0xff] }
  0x16   : > { %1101 = vmatprep.subr.bf16.mxu1 %v1100_v53  ;;  %811 = vperm.xlu1 %1266, %v804_v19   ;;  %v184_v35 = vld [vmem:[%s2045_s4 + $0x158] sm:$0xff]  ;;  %v1086_v38 = vpack.c.bf16 %v180_v34, %v177_v33  ;;  %v182_v40 = vld [vmem:[%s2045_s4 + $0x148] sm:$0xff]  ;;  %v183_v42 = vld [vmem:[%s2045_s4 + $0x150] sm:$0xff]  ;;  %p1323_p5 = pnand (%p114_p0), %p1322_p4, %p1316_p1 }
  0x17   : > { %814 = vperm.xlu0 %1265, %v805_v27   ;;  %v1088_v41 = vpack.c.bf16 %v187_v37, %v184_v35  ;;  %v186_v43 = vld [vmem:[%s2045_s4 + $0x168] sm:$0xff]  ;;  %v501_v45 = vld [vmem:[%s2046_s5 + $0x20] sm:$0xff]  ;;  %v1116_v46 = vpack.c.bf16 %v182_v40, %v179_v39  ;;  %v188_v49 = vld [vmem:[%s2045_s4 + $0x178] sm:$0xff] }
  0x18   : > { %1075 = vmatpush1.bf16.msra.mxu0 %v1074_v55  ;;  %v498_v44 = vld [vmem:[%s2046_s5 + $0x8] sm:$0xff]  ;;  %v1090_v47 = vpack.c.bf16 %v186_v43, %v183_v42  ;;  %v185_v48 = vld [vmem:[%s2045_s4 + $0x160] sm:$0xff]  ;;  %v500_v52 = vld [vmem:[%s2046_s5 + $0x18] sm:$0xff] }
  0x19   : > { %1077 = vmatprep.subr.bf16.mxu0 %v1076_v59  ;;  %1103 = vmatpush3.bf16.msra.mxu1 %v1100_v53  ;;  %v1124_v50 = vpack.c.bf16 %v501_v45, %v498_v44  ;;  %v497_v51 = vld [vmem:[%s2046_s5] sm:$0xff]  ;;  %v504_v53 = vld [vmem:[%s2046_s5 + $0x38] sm:$0xff]  ;;  %v507_v54 = vld [vmem:[%s2046_s5 + $0x50] sm:$0xff]  ;;  %v1120_v55 = vpack.c.bf16 %v188_v49, %v185_v48 }
  0x1a   : > { %1105 = vmatprep.subr.bf16.mxu1 %v1104_v14  ;;  %817 = vperm.xlu1 %1266, %v806_v31   ;;  %v1126_v56 = vpack.c.bf16 %v500_v52, %v497_v51  ;;  %v499_v57 = vld [vmem:[%s2046_s5 + $0x10] sm:$0xff]  ;;  %v502_v58 = vld [vmem:[%s2046_s5 + $0x28] sm:$0xff]  ;;  %v1128_v59 = vpack.c.bf16 %v507_v54, %v504_v53  ;;  %v513_v63 = vld [vmem:[%s2046_s5 + $0x80] sm:$0xff] }
  0x1b   : > { %v503_v60 = vld [vmem:[%s2046_s5 + $0x30] sm:$0xff]  ;;  %v506_v61 = vld [vmem:[%s2046_s5 + $0x48] sm:$0xff]  ;;  %v508_v17 = vld [vmem:[%s2046_s5 + $0x58] sm:$0xff] }
  0x1c   : > { %1079 = vmatpush1.bf16.msra.mxu0 %v1078_v16  ;;  %v510_v62 = vld [vmem:[%s2046_s5 + $0x68] sm:$0xff]  ;;  %v1130_v15 = vpack.c.bf16 %v506_v61, %v503_v60  ;;  %v505_v16 = vld [vmem:[%s2046_s5 + $0x40] sm:$0xff]  ;;  %v516_v22 = vld [vmem:[%s2046_s5 + $0x98] sm:$0xff] }
  0x1d   : > { %1081 = vmatprep.subr.bf16.mxu0 %v1080_v20  ;;  %1107 = vmatpush3.bf16.msra.mxu1 %v1104_v14  ;;  %v1156_v14 = vpack.c.bf16 %v502_v58, %v499_v57  ;;  %v1132_v18 = vpack.c.bf16 %v513_v63, %v510_v62  ;;  %v509_v19 = vld [vmem:[%s2046_s5 + $0x60] sm:$0xff]  ;;  %v512_v20 = vld [vmem:[%s2046_s5 + $0x78] sm:$0xff]  ;;  %v519_v23 = vld [vmem:[%s2046_s5 + $0xb0] sm:$0xff]  ;;  %v1160_v24 = vpack.c.bf16 %v508_v17, %v505_v16 }
  0x1e   : > { %1109 = vmatprep.subr.bf16.mxu1 %v1108_v26  ;;  %v1134_v25 = vpack.c.bf16 %v512_v20, %v509_v19  ;;  %v514_v27 = vld [vmem:[%s2046_s5 + $0x88] sm:$0xff]  ;;  %v515_v29 = vld [vmem:[%s2046_s5 + $0x90] sm:$0xff]  ;;  %v517_v35 = vld [vmem:[%s2046_s5 + $0xa0] sm:$0xff] }
  0x1f   : > { %v518_v30 = vld [vmem:[%s2046_s5 + $0xa8] sm:$0xff]  ;;  %v520_v37 = vld [vmem:[%s2046_s5 + $0xb8] sm:$0xff]  ;;  %v523_v44 = vld [vmem:[%s2046_s5 + $0xd0] sm:$0xff] }
  0x20   : > { %1083 = vmatpush1.bf16.msra.mxu0 %v1082_v28  ;;  %v1136_v28 = vpack.c.bf16 %v519_v23, %v516_v22  ;;  %v522_v31 = vld [vmem:[%s2046_s5 + $0xc8] sm:$0xff]  ;;  %v1138_v34 = vpack.c.bf16 %v518_v30, %v515_v29  ;;  %v524_v39 = vld [vmem:[%s2046_s5 + $0xd8] sm:$0xff]  ;;  %v1168_v42 = vpack.c.bf16 %v520_v37, %v517_v35  ;;  %v529_v53 = vld [vmem:[%s2046_s5 + $0x100] sm:$0xff] }
  0x21   : > { %1085 = vmatprep.subr.bf16.mxu0 %v1084_v32  ;;  %1111 = vmatpush3.bf16.msra.mxu1 %v1108_v26  ;;  %v511_v26 = vld [vmem:[%s2046_s5 + $0x70] sm:$0xff]  ;;  %v525_v32 = vld [vmem:[%s2046_s5 + $0xe0] sm:$0xff]  ;;  %v528_v40 = vld [vmem:[%s2046_s5 + $0xf8] sm:$0xff] }
  0x22   : > { %1113 = vmatprep.subr.bf16.mxu1 %v1112_v36  ;;  %v1164_v33 = vpack.c.bf16 %v514_v27, %v511_v26  ;;  %v526_v45 = vld [vmem:[%s2046_s5 + $0xe8] sm:$0xff]  ;;  %v532_v54 = vld [vmem:[%s2046_s5 + $0x118] sm:$0xff]  ;;  %v535_v62 = vld [vmem:[%s2046_s5 + $0x130] sm:$0xff] }
  0x23   : > { %v530_v48 = vld [vmem:[%s2046_s5 + $0x108] sm:$0xff]  ;;  %v1172_v51 = vpack.c.bf16 %v526_v45, %v523_v44  ;;  %v536_v57 = vld [vmem:[%s2046_s5 + $0x138] sm:$0xff]  ;;  %v1176_v60 = vpack.c.bf16 %v532_v54, %v529_v53  ;;  %v541_v19 = vld [vmem:[%s2046_s5 + $0x160] sm:$0xff] }
  0x24   : > { %1087 = vmatpush1.bf16.msra.mxu0 %v1086_v38  ;;  %v521_v38 = vld [vmem:[%s2046_s5 + $0xc0] sm:$0xff]  ;;  %v534_v49 = vld [vmem:[%s2046_s5 + $0x128] sm:$0xff]  ;;  %v540_v58 = vld [vmem:[%s2046_s5 + $0x158] sm:$0xff] }
  0x25   : > { %1089 = vmatprep.subr.bf16.mxu0 %v1088_v41  ;;  %1115 = vmatpush3.bf16.msra.mxu1 %v1112_v36  ;;  %v1140_v36 = vpack.c.bf16 %v525_v32, %v522_v31  ;;  %v531_v41 = vld [vmem:[%s2046_s5 + $0x110] sm:$0xff]  ;;  %v1142_v43 = vpack.c.bf16 %v524_v39, %v521_v38  ;;  %v538_v63 = vld [vmem:[%s2046_s5 + $0x148] sm:$0xff]  ;;  %v544_v20 = vld [vmem:[%s2046_s5 + $0x178] sm:$0xff] }
  0x26   : > { %1117 = vmatprep.subr.bf16.mxu1 %v1116_v46  ;;  %v542_v16 = vld [vmem:[%s2046_s5 + $0x168] sm:$0xff]  ;;  %v1180_v17 = vpack.c.bf16 %v538_v63, %v535_v62  ;;  %v1184_v22 = vpack.c.bf16 %v544_v20, %v541_v19  ;;  %v129_v23 = vld [vmem:[%s1911_s16] sm:$0xff]  ;;  %v132_v27 = vld [vmem:[%s1911_s16 + $0x18] sm:$0xff] }
  0x27   : > { %v133_v29 = vld [vmem:[%s1911_s16 + $0x20] sm:$0xff]  ;;  %v135_v35 = vld [vmem:[%s1911_s16 + $0x30] sm:$0xff]  ;;  %v136_v38 = vld [vmem:[%s1911_s16 + $0x38] sm:$0xff] }
  0x28   : > { %1091 = vmatpush1.bf16.msra.mxu0 %v1090_v47  ;;  %v527_v47 = vld [vmem:[%s2046_s5 + $0xf0] sm:$0xff] }
  0x29   : > { %1125 = vmatprep.subr.bf16.mxu0 %v1124_v50  ;;  %1119 = vmatpush3.bf16.msra.mxu1 %v1116_v46  ;;  %v1144_v46 = vpack.c.bf16 %v531_v41, %v528_v40  ;;  %v537_v50 = vld [vmem:[%s2046_s5 + $0x140] sm:$0xff]  ;;  %v1146_v52 = vpack.c.bf16 %v530_v48, %v527_v47  ;;  %v131_v63 = vld [vmem:[%s1911_s16 + $0x10] sm:$0xff] }
  0x2a   : > { %1121 = vmatprep.subr.bf16.mxu1 %v1120_v55 }
  0x2b   : > { %254 = vmatmul.mubr.f32.vlgmr.msra.gmra.mrb[0].mxu0 %v1405_v0 }
  0x2c   : > { %1127 = vmatpush1.bf16.msra.mxu0 %v1126_v56  ;;  %259 = vmatprep.mubr.f32.mxu0 %v1411_v21  ;;  %v533_v56 = vld [vmem:[%s2046_s5 + $0x120] sm:$0xff] }
  0x2d   : > { %1129 = vmatprep.subr.bf16.mxu0 %v1128_v59  ;;  %1123 = vmatpush3.bf16.msra.mxu1 %v1120_v55  ;;  %v1148_v55 = vpack.c.bf16 %v537_v50, %v534_v49  ;;  %v543_v59 = vld [vmem:[%s2046_s5 + $0x170] sm:$0xff]  ;;  %v1150_v61 = vpack.c.bf16 %v536_v57, %v533_v56 }
  0x2e   : > { %1157 = vmatprep.subr.bf16.mxu1 %v1156_v14  ;;  %v139_v49 = vld [vmem:[%s1911_s16 + $0x50] sm:$0xff] }
  0x2f   : > { %260 = vmatmul.mubr.f32.gmra.mrb[2].mxu0 %v1401_v1 }
  0x30   : > { %1131 = vmatpush1.bf16.msra.mxu0 %v1130_v15  ;;  %265 = vmatprep.mubr.f32.mxu0 %v1411_v21  ;;  %v539_v15 = vld [vmem:[%s2046_s5 + $0x150] sm:$0xff] }
  0x31   : > { %1133 = vmatprep.subr.bf16.mxu0 %v1132_v18  ;;  %1017 = vmatmul.mubr.f32.vlgmr.msra.gmra.mrb[0].mxu1 %v1401_v1  ;;  %v1154_v18 = vpack.c.bf16 %v542_v16, %v539_v15 }
  0x32   : > { %1159 = vmatpush3.bf16.msra.mxu1 %v1156_v14  ;;  %1019 = vmatprep.mubr.f32.mxu1 %v1397_v2  ;;  %v1152_v14 = vpack.c.bf16 %v543_v59, %v540_v58 }
  0x33   : > { %266 = vmatmul.mubr.f32.gmra.mrb[4].mxu0 %v1397_v2  ;;  %1161 = vmatprep.subr.bf16.mxu1 %v1160_v24 }
  0x34   : > { %1135 = vmatpush1.bf16.msra.mxu0 %v1134_v25  ;;  %271 = vmatprep.mubr.f32.mxu0 %v1411_v21 }
  0x35   : > { %1137 = vmatprep.subr.bf16.mxu0 %v1136_v28  ;;  %1020 = vmatmul.mubr.f32.gmra.mrb[2].mxu1 %v1393_v3 }
  0x36   : > { %1163 = vmatpush3.bf16.msra.mxu1 %v1160_v24  ;;  %1054 = vmatprep.mubr.f32.mxu1 %v1389_v4 }
  0x37   : > { %272 = vmatmul.mubr.f32.gmra.mrb[6].mxu0 %v1393_v3  ;;  %1165 = vmatprep.subr.bf16.mxu1 %v1164_v33 }
  0x38   : > { %1139 = vmatpush1.bf16.msra.mxu0 %v1138_v34  ;;  %609 = vmatprep.mubr.f32.mxu0 %v1411_v21 }
  0x39   : > { %1141 = vmatprep.subr.bf16.mxu0 %v1140_v36 }
  0x3a   : > { %1167 = vmatpush3.bf16.msra.mxu1 %v1164_v33 }
  0x3b   : > { %1169 = vmatprep.subr.bf16.mxu1 %v1168_v42 }
  0x3c   : > { %1143 = vmatpush1.bf16.msra.mxu0 %v1142_v43 }
  0x3d   : > { %1145 = vmatprep.subr.bf16.mxu0 %v1144_v46  ;;  %v138_v46 = vld [vmem:[%s1911_s16 + $0x48] sm:$0xff] }
  0x3e   : > { %1171 = vmatpush3.bf16.msra.mxu1 %v1168_v42 }
  0x3f   : > { %1173 = vmatprep.subr.bf16.mxu1 %v1172_v51 }
  0x40   : > { %1147 = vmatpush1.bf16.msra.mxu0 %v1146_v52 }
  0x41   : > { %1149 = vmatprep.subr.bf16.mxu0 %v1148_v55 }
  0x42   : > { %1175 = vmatpush3.bf16.msra.mxu1 %v1172_v51 }
  0x43   : > { %1177 = vmatprep.subr.bf16.mxu1 %v1176_v60 }
  0x44   : > { %1151 = vmatpush1.bf16.msra.mxu0 %v1150_v61 }
  0x45   : > { %1153 = vmatprep.subr.bf16.mxu0 %v1152_v14 }
  0x46   : > { %1179 = vmatpush3.bf16.msra.mxu1 %v1176_v60 }
  0x47   : > { %1181 = vmatprep.subr.bf16.mxu1 %v1180_v17 }
  0x48   : > { %1155 = vmatpush1.bf16.msra.mxu0 %v1154_v18 }
  0x4a   : > { %1183 = vmatpush3.bf16.msra.mxu1 %v1180_v17 }
  0x4b   : > { %610 = vmatmul.mubr.f32.vlgmr.msra.gmra.mrb[8].mxu0 %v1389_v4  ;;  %1185 = vmatprep.subr.bf16.mxu1 %v1184_v22 }
  0x4c   : > { %615 = vmatprep.mubr.f32.mxu0 %v1411_v21 }
  0x4e   : > { %1187 = vmatpush3.bf16.msra.mxu1 %v1184_v22  ;;  %v134_v22 = vld [vmem:[%s1911_s16 + $0x28] sm:$0xff] }
  0x4f   : > { %616 = vmatmul.mubr.f32.gmra.mrb[10].mxu0 %v1385_v5 }
  0x50   : > { %621 = vmatprep.mubr.f32.mxu0 %v1411_v21 }
  0x51   : > { %1055 = vmatmul.mubr.f32.vlgmr.msra.gmra.mrb[4].mxu1 %v1385_v5 }
  0x52   : > { %1057 = vmatprep.mubr.f32.mxu1 %v1381_v6 }
  0x53   : > { %622 = vmatmul.mubr.f32.gmra.mrb[12].mxu0 %v1381_v6 }
  0x54   : > { %627 = vmatprep.mubr.f32.mxu0 %v1411_v21  ;;  %v130_v21 = vld [vmem:[%s1911_s16 + $0x8] sm:$0xff] }
  0x55   : > { %1058 = vmatmul.mubr.f32.gmra.mrb[6].mxu1 %v1377_v7 }
  0x57   : > { %628 = vmatmul.mubr.f32.gmra.mrb[14].mxu0 %v1377_v7 }
  0xfe   : > { %v255_v24 = vpop.f32.mrb[0].mxu0 }
  0xff   : > { %v363_v25 = vadd.f32 %v255_v24, %v129_v23  ;;  %v257_v26 = vpop.f32.mrb[1].mxu0 }
 0x100   : > { %v364_v30 = vadd.f32 %v257_v26, %v130_v21 }
 0x101   : > { %v371_v28 = vmul.f32 0.5, %v363_v25 }
 0x102   : > { %v261_v31 = vpop.f32.mrb[2].mxu0  ;;  %v372_v40 = vmul.f32 0.5, %v364_v30 }
 0x103   : > { %1267 = vtanh.f32 %v371_v28  ;;  %v365_v32 = vadd.f32 %v261_v31, %v132_v27  ;;  %v263_v33 = vpop.f32.mrb[3].mxu0 }
 0x104   : > { %v366_v34 = vadd.f32 %v263_v33, %v133_v29  ;;  %v1018_v37 = vpop.f32.mrb[0].mxu1 }
 0x105   : > { %v373_v36 = vmul.f32 0.5, %v365_v32  ;;  %v344_v39 = vpop.f32.mrb[1].mxu1  ;;  %v410_v15 = vadd.f32 %v1018_v37, %v1518_v12  ;;  %v137_v32 = vld [vmem:[%s1911_s16 + $0x40] sm:$0xff] }
 0x106   : > { %v267_v41 = vpop.f32.mrb[4].mxu0  ;;  %v374_v44 = vmul.f32 0.5, %v366_v34  ;;  %v409_v59 = vadd.f32 %v1518_v12, %v344_v39 }
 0x107   : > { %1269 = vtanh.f32 %v373_v36  ;;  %v367_v42 = vadd.f32 %v267_v41, %v135_v35  ;;  %v269_v43 = vpop.f32.mrb[5].mxu0  ;;  %v453_v41 = vpop.permute.xlu0 %452 }
 0x108   : > { %v368_v45 = vadd.f32 %v269_v43, %v136_v38  ;;  %v1021_v47 = vpop.f32.mrb[2].mxu1  ;;  %1271 = vtanh.f32 %v372_v40  ;;  %v485_v40 = vld [vmem:[%s1930_s6] sm:$0xff]  ;;  %vm463_vm8 = vcmp.eq.s32.totalorder %v453_v41, 1 }
 0x109   : > { %v375_v48 = vmul.f32 0.5, %v367_v42  ;;  %v354_v50 = vpop.f32.mrb[3].mxu1  ;;  %v412_v34 = vadd.f32 %v1021_v47, %v1518_v12 }
 0x10a   : > { %v376_v51 = vmul.f32 0.5, %v368_v45  ;;  %v273_v52 = vpop.f32.mrb[6].mxu0  ;;  %v411_v21 = vadd.f32 %v1518_v12, %v354_v50  ;;  %v486_v50 = vld [vmem:[%s1930_s6 + $0x8] sm:$0xff] }
 0x10b   : > { %1273 = vtanh.f32 %v375_v48  ;;  %v369_v53 = vadd.f32 %v273_v52, %v138_v46  ;;  %v275_v54 = vpop.f32.mrb[7].mxu0 }
 0x10c   : > { %1275 = vtanh.f32 %v374_v44  ;;  %v370_v55 = vadd.f32 %v275_v54, %v139_v49  ;;  %v140_v44 = vld [vmem:[%s1911_s16 + $0x58] sm:$0xff] }
 0x10d   : > { %v1268_v56 = vpop.eup %1267  ;;  %v377_v57 = vmul.f32 0.5, %v369_v53  ;;  %1277 = vtanh.f32 %v376_v51 }
 0x10e   : > { %v387_v58 = vmul.f32 0.5, %v1268_v56  ;;  %v378_v60 = vmul.f32 0.5, %v370_v55  ;;  %v488_v55 = vld [vmem:[%s1930_s6 + $0x18] sm:$0xff] }
 0x10f   : > { %1279 = vtanh.f32 %v377_v57 }
 0x110   : > { %v395_v61 = vadd.f32 0.5, %v387_v58  ;;  %1281 = vtanh.f32 %v378_v60 }
 0x111   : > { %v1270_v62 = vpop.eup %1269 }
 0x112   : > { %v389_v14 = vmul.f32 0.5, %v1270_v62  ;;  %v413_v16 = vmul.f32 %v409_v59, %v395_v61  ;;  %v1272_v17 = vpop.eup %1271  ;;  %v456_v62 = vpop.permute.xlu0 %455 }
 0x113   : > { %v388_v26 = vmul.f32 0.5, %v1272_v17  ;;  %vm464_vm9 = vcmp.eq.s32.totalorder %v456_v62, 1 }
 0x114   : > { %v397_v18 = vadd.f32 0.5, %v389_v14  ;;  %v417_v19 = vadd.f32 %v413_v16, %v131_v63 }
 0x115   : > { %v1274_v20 = vpop.eup %1273  ;;  %v396_v37 = vadd.f32 0.5, %v388_v26 }
 0x116   : > { %v1276_v23 = vpop.eup %1275  ;;  %v391_v24 = vmul.f32 0.5, %v1274_v20  ;;  %v414_v25 = vmul.f32 %v410_v15, %v397_v18  ;;  %1283 = vtanh.f32 %v417_v19  ;;  %v489_v15 = vld [vmem:[%s1930_s6 + $0x20] sm:$0xff]  ;;  %v459_v18 = vpop.permute.xlu1 %458 }
 0x117   : > { %v1278_v27 = vpop.eup %1277  ;;  %v390_v31 = vmul.f32 0.5, %v1276_v23  ;;  %v425_v48 = vsub.f32 1.0, %v396_v37  ;;  %v433_v59 = vmul.f32 %v1405_v0, %v396_v37  ;;  %v491_v23 = vld [vmem:[%s1930_s6 + $0x30] sm:$0xff]  ;;  %vm465_vm10 = vcmp.eq.s32.totalorder %v459_v18, 1 }
 0x118   : > { %v418_v28 = vadd.f32 %v414_v25, %v134_v22  ;;  %v399_v29 = vadd.f32 0.5, %v391_v24  ;;  %v392_v36 = vmul.f32 0.5, %v1278_v27 }
 0x119   : > { %v1280_v30 = vpop.eup %1279  ;;  %v398_v43 = vadd.f32 0.5, %v390_v31 }
 0x11a   : > { %v393_v33 = vmul.f32 0.5, %v1280_v30  ;;  %1285 = vtanh.f32 %v418_v28  ;;  %v415_v35 = vmul.f32 %v411_v21, %v399_v29  ;;  %v1282_v42 = vpop.eup %1281  ;;  %v400_v52 = vadd.f32 0.5, %v392_v36 }
 0x11b   : > { %v394_v54 = vmul.f32 0.5, %v1282_v42  ;;  %v426_v56 = vsub.f32 1.0, %v398_v43  ;;  %v434_v17 = vmul.f32 %v1401_v1, %v398_v43  ;;  %v495_v43 = vld [vmem:[%s1930_s6 + $0x50] sm:$0xff] }
 0x11c   : > { %v401_v38 = vadd.f32 0.5, %v393_v33  ;;  %v419_v39 = vadd.f32 %v415_v35, %v137_v32  ;;  %v427_v20 = vsub.f32 1.0, %v400_v52  ;;  %v492_v33 = vld [vmem:[%s1930_s6 + $0x38] sm:$0xff]  ;;  %v435_v37 = vmul.f32 %v1397_v2, %v400_v52 }
 0x11d   : > { %v402_v22 = vadd.f32 0.5, %v394_v54 }
 0x11e   : > { %v416_v45 = vmul.f32 %v412_v34, %v401_v38  ;;  %1287 = vtanh.f32 %v419_v39  ;;  %v611_v46 = vpop.f32.mrb[8].mxu0  ;;  %v494_v38 = vld [vmem:[%s1930_s6 + $0x48] sm:$0xff] }
 0x11f   : > { %v719_v49 = vadd.f32 %v611_v46, %v485_v40  ;;  %v613_v47 = vpop.f32.mrb[9].mxu0  ;;  %v428_v36 = vsub.f32 1.0, %v402_v22 }
 0x120   : > { %v1284_v51 = vpop.eup %1283  ;;  %v420_v53 = vadd.f32 %v416_v45, %v140_v44  ;;  %v720_v60 = vadd.f32 %v613_v47, %v486_v50  ;;  %v462_v45 = vpop.permute.xlu1 %461 }
 0x121   : > { %v727_v57 = vmul.f32 0.5, %v719_v49  ;;  %v429_v58 = vmul.f32 %v1284_v51, %v425_v48  ;;  %vm466_vm11 = vcmp.eq.s32.totalorder %v462_v45, 1  ;;  %v496_v45 = vld [vmem:[%s1930_s6 + $0x58] sm:$0xff] }
 0x122   : > { %1289 = vtanh.f32 %v420_v53  ;;  %v617_v61 = vpop.f32.mrb[10].mxu0  ;;  %v728_v29 = vmul.f32 0.5, %v720_v60  ;;  %v436_v53 = vmul.f32 %v1393_v3, %v402_v22 }
 0x123   : > { %1291 = vtanh.f32 %v727_v57  ;;  %v721_v63 = vadd.f32 %v617_v61, %v488_v55  ;;  %v437_v14 = vadd.f32 %v433_v59, %v429_v58  ;;  %v619_v16 = vpop.f32.mrb[11].mxu0 }
 0x124   : > { %v1286_v19 = vpop.eup %1285  ;;  %v1056_v24 = vpop.f32.mrb[4].mxu1  ;;  %v722_v30 = vadd.f32 %v619_v16, %v489_v15 }
 0x125   : > { %v729_v25 = vmul.f32 0.5, %v721_v63  ;;  %v1950_v0 = vsel %vm463_vm8, %v437_v14, %v1405_v0   ;;  %v471_v26 = vsel %vm463_vm8, %v437_v14, 0.0  ;;  %v430_v27 = vmul.f32 %v1286_v19, %v426_v56  ;;  %v700_v28 = vpop.f32.mrb[5].mxu1 }
 0x126   : > { %v2052_v21 = vmov %v1950_v0  ;;  %477 = vst [vmem:[%s1943_s22] sm:$0xff] %v471_v26  ;;  %v623_v31 = vpop.f32.mrb[12].mxu0  ;;  %v730_v48 = vmul.f32 0.5, %v722_v30  ;;  %v765_v62 = vadd.f32 %v1523_v13, %v700_v28  ;;  %v490_v28 = vld [vmem:[%s1930_s6 + $0x28] sm:$0xff] }
 0x127   : > { %1293 = vtanh.f32 %v729_v25  ;;  %v723_v32 = vadd.f32 %v623_v31, %v491_v23  ;;  %v625_v34 = vpop.f32.mrb[13].mxu0  ;;  %v438_v35 = vadd.f32 %v434_v17, %v430_v27  ;;  %v487_v17 = vld [vmem:[%s1930_s6 + $0x10] sm:$0xff]  ;;  %837 = vst [vmem:[#allocation2] sm:$0xff] (%p114_p0), %v2052_v21 }
 0x128   : > { %v1288_v0 = vpop.eup %1287  ;;  %v1957_v39 = vpop.f32.mrb[6].mxu1  ;;  %1295 = vtanh.f32 %v728_v29  ;;  %v724_v49 = vadd.f32 %v625_v34, %v492_v33 }
 0x129   : > { %v731_v40 = vmul.f32 0.5, %v723_v32  ;;  %v1960_v1 = vsel %vm464_vm9, %v438_v35, %v1401_v1   ;;  %v472_v42 = vsel %vm464_vm9, %v438_v35, 0.0  ;;  %v431_v44 = vmul.f32 %v1288_v0, %v427_v20  ;;  %v710_v46 = vpop.f32.mrb[7].mxu1  ;;  %v493_v35 = vld [vmem:[%s1930_s6 + $0x40] sm:$0xff] }
 0x12a   : > { %v2053_v41 = vmov %v1960_v1  ;;  %478 = vst [vmem:[%s1943_s22 + $0x8] sm:$0xff] %v472_v42  ;;  %v629_v50 = vpop.f32.mrb[14].mxu0  ;;  %v732_v61 = vmul.f32 0.5, %v724_v49  ;;  %v766_v20 = vadd.f32 %v1056_v24, %v1523_v13  ;;  %v768_v0 = vadd.f32 %v1957_v39, %v1523_v13 }
 0x12b   : > { %1297 = vtanh.f32 %v731_v40  ;;  %v725_v47 = vadd.f32 %v629_v50, %v494_v38  ;;  %v631_v51 = vpop.f32.mrb[15].mxu0  ;;  %v439_v52 = vadd.f32 %v435_v37, %v431_v44  ;;  %838 = vst [vmem:[#allocation2 + $0x8] sm:$0xff] (%p114_p0), %v2053_v41 }
 0x12c   : > { %v1290_v54 = vpop.eup %1289  ;;  %v726_v1 = vadd.f32 %v631_v51, %v495_v43  ;;  %1299 = vtanh.f32 %v730_v48 }
 0x12d   : > { %v1292_v55 = vpop.eup %1291  ;;  %v733_v56 = vmul.f32 0.5, %v725_v47  ;;  %v1966_v2 = vsel %vm465_vm10, %v439_v52, %v1397_v2   ;;  %v473_v58 = vsel %vm465_vm10, %v439_v52, 0.0  ;;  %v432_v59 = vmul.f32 %v1290_v54, %v428_v36 }
 0x12e   : > { %v2054_v57 = vmov %v1966_v2  ;;  %v743_v60 = vmul.f32 0.5, %v1292_v55  ;;  %479 = vst [vmem:[%s1943_s22 + $0x10] sm:$0xff] %v473_v58  ;;  %v734_v16 = vmul.f32 0.5, %v726_v1 }
 0x12f   : > { %1301 = vtanh.f32 %v733_v56  ;;  %v440_v63 = vadd.f32 %v436_v53, %v432_v59  ;;  %v809_v53 = vpop.permute.xlu0 %808  ;;  %839 = vst [vmem:[#allocation2 + $0x10] sm:$0xff] (%p114_p0), %v2054_v57 }
 0x130   : > { %v751_v14 = vadd.f32 0.5, %v743_v60  ;;  %1303 = vtanh.f32 %v732_v61  ;;  %vm819_vm12 = vcmp.eq.s32.totalorder %v809_v53, 1 }
 0x131   : > { %v1294_v15 = vpop.eup %1293  ;;  %v1973_v3 = vsel %vm466_vm11, %v440_v63, %v1393_v3   ;;  %v474_v2 = vsel %vm466_vm11, %v440_v63, 0.0  ;;  %1305 = vtanh.f32 %v734_v16 }
 0x132   : > { %v2055_v18 = vmov %v1973_v3  ;;  %v745_v19 = vmul.f32 0.5, %v1294_v15  ;;  %v769_v22 = vmul.f32 %v765_v62, %v751_v14  ;;  %480 = vst [vmem:[%s1943_s22 + $0x18] sm:$0xff] %v474_v2  ;;  %v1296_v23 = vpop.eup %1295  ;;  %v767_v3 = vadd.f32 %v1523_v13, %v710_v46  ;;  %v812_v15 = vpop.permute.xlu1 %811 }
 0x133   : > { %v744_v31 = vmul.f32 0.5, %v1296_v23  ;;  %vm820_vm13 = vcmp.eq.s32.totalorder %v812_v15, 1  ;;  %840 = vst [vmem:[#allocation2 + $0x18] sm:$0xff] (%p114_p0), %v2055_v18 }
 0x134   : > { %v753_v25 = vadd.f32 0.5, %v745_v19  ;;  %v773_v26 = vadd.f32 %v769_v22, %v487_v17  ;;  %v815_v22 = vpop.permute.xlu0 %814 }
 0x135   : > { %v1298_v27 = vpop.eup %1297  ;;  %v752_v38 = vadd.f32 0.5, %v744_v31  ;;  %vm821_vm14 = vcmp.eq.s32.totalorder %v815_v22, 1 }
 0x136   : > { %v770_v29 = vmul.f32 %v766_v20, %v753_v25  ;;  %1307 = vtanh.f32 %v773_v26  ;;  %v747_v30 = vmul.f32 0.5, %v1298_v27  ;;  %v1300_v32 = vpop.eup %1299 }
 0x137   : > { %v746_v40 = vmul.f32 0.5, %v1300_v32  ;;  %v781_v49 = vsub.f32 1.0, %v752_v38  ;;  %v789_v39 = vmul.f32 %v1389_v4, %v752_v38 }
 0x138   : > { %v774_v33 = vadd.f32 %v770_v29, %v490_v28  ;;  %v755_v34 = vadd.f32 0.5, %v747_v30  ;;  %v818_v28 = vpop.permute.xlu1 %817 }
 0x139   : > { %v1302_v24 = vpop.eup %1301  ;;  %v754_v50 = vadd.f32 0.5, %v746_v40  ;;  %vm822_vm15 = vcmp.eq.s32.totalorder %v818_v28, 1 }
 0x13a   : > { %v749_v37 = vmul.f32 0.5, %v1302_v24  ;;  %1309 = vtanh.f32 %v774_v33  ;;  %v771_v36 = vmul.f32 %v767_v3, %v755_v34  ;;  %v1304_v42 = vpop.eup %1303 }
 0x13b   : > { %v1306_v48 = vpop.eup %1305  ;;  %v748_v47 = vmul.f32 0.5, %v1304_v42  ;;  %v782_v1 = vsub.f32 1.0, %v754_v50  ;;  %v790_v61 = vmul.f32 %v1385_v5, %v754_v50 }
 0x13c   : > { %v757_v43 = vadd.f32 0.5, %v749_v37  ;;  %v775_v44 = vadd.f32 %v771_v36, %v493_v35  ;;  %v750_v56 = vmul.f32 0.5, %v1306_v48 }
 0x13d   : > { %v756_v55 = vadd.f32 0.5, %v748_v47 }
 0x13e   : > { %v772_v46 = vmul.f32 %v768_v0, %v757_v43  ;;  %1311 = vtanh.f32 %v775_v44  ;;  %v758_v14 = vadd.f32 0.5, %v750_v56  ;;  %v2063_v0 = vmov %v2052_v21 }
 0x13f   : > { %v783_v17 = vsub.f32 1.0, %v756_v55  ;;  %v791_v25 = vmul.f32 %v1381_v6, %v756_v55 }
 0x140   : > { %v1308_v51 = vpop.eup %1307  ;;  %v776_v52 = vadd.f32 %v772_v46, %v496_v45  ;;  %v784_v26 = vsub.f32 1.0, %v758_v14  ;;  %v792_v30 = vmul.f32 %v1377_v7, %v758_v14 }
 0x141   : > { %v785_v54 = vmul.f32 %v1308_v51, %v781_v49 }
 0x142   : > { %1313 = vtanh.f32 %v776_v52 }
 0x143   : > { %v793_v58 = vadd.f32 %v789_v39, %v785_v54 }
 0x144   : > { %v1310_v59 = vpop.eup %1309 }
 0x145   : > { %v786_v60 = vmul.f32 %v1310_v59, %v782_v1  ;;  %v823_v62 = vsel %vm819_vm12, %v793_v58, %v1389_v4   ;;  %v827_v63 = vsel %vm819_vm12, %v793_v58, 0.0  ;;  %v2062_v1 = vmov %v2053_v41 }
 0x146   : > { %833 = vst [vmem:[%s1989_s26] sm:$0xff] %v827_v63  ;;  %841 = vst [vmem:[#allocation2 + $0x20] sm:$0xff] (%p114_p0), %v823_v62 }
 0x147   : > { %v794_v16 = vadd.f32 %v790_v61, %v786_v60 }
 0x148   : > { %v1312_v2 = vpop.eup %1311 }
 0x149   : > { %v824_v19 = vsel %vm820_vm13, %v794_v16, %v1385_v5   ;;  %v828_v20 = vsel %vm820_vm13, %v794_v16, 0.0  ;;  %v787_v23 = vmul.f32 %v1312_v2, %v783_v17  ;;  %v2061_v2 = vmov %v2054_v57 }
 0x14a   : > { %834 = vst [vmem:[%s1989_s26 + $0x8] sm:$0xff] %v828_v20  ;;  %842 = vst [vmem:[#allocation2 + $0x28] sm:$0xff] (%p114_p0), %v824_v19 }
 0x14b   : > { %v795_v4 = vadd.f32 %v791_v25, %v787_v23 }
 0x14c   : > { %v1314_v27 = vpop.eup %1313  ;;  %116 = sbr.rel (!%p114_p0) target bundleno = 8 (0x8), region = 91 }
 0x14d   : > { %v788_v29 = vmul.f32 %v1314_v27, %v784_v26  ;;  %v825_v31 = vsel %vm821_vm14, %v795_v4, %v1381_v6   ;;  %v829_v3 = vsel %vm821_vm14, %v795_v4, 0.0  ;;  %v2059_v4 = vmov %v823_v62 }
 0x14e   : > { %835 = vst [vmem:[%s1989_s26 + $0x10] sm:$0xff] %v829_v3  ;;  %v2057_v6 = vmov %v825_v31  ;;  %v2060_v3 = vmov %v2055_v18  ;;  %843 = vst [vmem:[#allocation2 + $0x30] sm:$0xff] (%p114_p0), %v825_v31 }
 0x14f   : > { %v796_v5 = vadd.f32 %v792_v30, %v788_v29 }
 0x151   : > { %v826_v32 = vsel %vm822_vm15, %v796_v5, %v1377_v7   ;;  %v830_v33 = vsel %vm822_vm15, %v796_v5, 0.0  ;;  %v2058_v5 = vmov %v824_v19 }
 0x152   : > { %836 = vst [vmem:[%s1989_s26 + $0x18] sm:$0xff] %v830_v33  ;;  %v2056_v7 = vmov %v826_v32  ;;  %844 = vst [vmem:[#allocation2 + $0x38] sm:$0xff] (%p114_p0), %v826_v32 }
 0x153   :  { %1326 = shalt.err (!%p1323_p5)
}
 0x154   :  { %s1327_s4 = scalar_lea.hbm %s2051_s10, 1024 }
 0x155   :  { %p1328_p6 = scmp.ne.s32.totalorder %s2051_s10, %s1327_s4  ;;  %p1331_p7 = scmp.lt.u32.totalorder %s1327_s4, %s2051_s10 }
 0x157   :  { %p1333_p8 = pnand %p1331_p7, %p1328_p6 }
 0x159   :  { %1336 = shalt.err (!%p1333_p8)
}
 0x15a   :  { %s1414_s30 = smov 128   ;;  %s1415_s11 = smov 8  }
 0x15b   :  { %869 = dma.vmem_to_hbm [thread:$0]  %s864_s28, 1024, %s2051_s10, [#allocation3], %s1414_s30, %s1414_s30, %s1415_s11  }
 0x15c   :  { %1373 = dma.done.wait [#allocation3], 1024  }
 0x15d   :  { %1374 = vsyncadd [#allocation3], 4294966272 }
 0x15e   :  { %884 = vsyncpa [#allocation3], 1 }

</bundles_post_ra>
